<compile_context>
chip_gen: v6e
topology: v6e:2x2x1
jax: 0.10.0
libtpu: 0.0.40
codegen_flags: <defaults>
</compile_context>

<pallas_src>
import jax
import jax.numpy as jnp
from jax import lax
from jax.experimental import pallas as pl
from jax.experimental.pallas import tpu as pltpu


# ---------------------------------------------------------------------------
# block-size selection
# ---------------------------------------------------------------------------
def _tpu_vmem_profile():
    """(per-block VMEM budget, vmem_limit_bytes, two_tensorcores) keyed on TPU generation."""
    cap = 64 << 20
    try:
        cap = int(getattr(pltpu.get_tpu_info(), "vmem_capacity_bytes", cap))
    except Exception:
        pass
    if cap >= (96 << 20):
        # v5e / v6e class: 128 MiB physical VMEM, one TensorCore -> big blocks
        return 28 << 20, min(100 << 20, cap - (16 << 20)), False
    # v7x class: 64 MiB VMEM per TensorCore, 2 TensorCores per chip
    return 14 << 20, max(32 << 20, min(48 << 20, cap - (8 << 20))), True


def _pick_batch_block(B, T, D, H, in_itemsize):
    """Largest 128-aligned batch block whose working set fits the per-generation budget."""
    budget, vmem_limit, two_core = _tpu_vmem_profile()
    # rough VMEM bytes per (batch*time) element: double-buffered obs/next_obs blocks, the f32
    # activations of both MLP passes, the flat reward/not_done/adv/value blocks and the scan
    # temporaries.
    per_elem = 4 * D * in_itemsize + 8 * H + 224
    max_rows = max(budget // (per_elem * T), 1)
    if B <= 128 or B % 128 != 0:
        # cannot tile the batch at lane granularity -> single full-batch block.
        # TODO(synk): very large batches that are not multiples of 128 are not tiled and may
        #             exceed the VMEM budget; pad the batch upstream in that case.
        return B, vmem_limit
    bb = min((max_rows // 128) * 128, B)
    if two_core:
        # keep >= 2 grid steps so the "parallel" grid axis shards across both TensorCores
        bb = min(bb, max(128, (B // 2 // 128) * 128))
    bb = max(bb, 128)
    while B % bb != 0:
        bb -= 128
    return bb, vmem_limit


# ---------------------------------------------------------------------------
# fused kernel: value MLP (obs + next_obs) + segmented log-depth TD(lambda) scan
# ---------------------------------------------------------------------------
def _shift_left(x, n):
    """Shift a [1, L] row left by n lanes (element l+n -> l), zero-filling on the right."""
    return jnp.concatenate([x[:, n:], jnp.zeros((x.shape[0], n), x.dtype)], axis=1)


def _make_td_lambda_kernel(c1, c2, b2):
    """c1 = gamma*(1-lmbda), c2 = gamma*lmbda, b2 = value-head bias (compile-time constants)."""

    def kernel(obs_ref, nobs_ref, rew_ref, nd_ref, tpos_ref, w1t_ref, b1_ref, w2_ref,
               adv_ref, val_ref):
        BB, T, D = obs_ref.shape
        f32 = jnp.float32
        nt_dims = (((1,), (1,)), ((), ()))     # contract last dims of both operands (A @ B^T)

        w1t = w1t_ref[...]                     # [H, D]
        b1 = b1_ref[...]                       # [H, 1]
        w2 = w2_ref[...]                       # [H, 1]

        # ---- value network, obs and next_obs passes -----------------------------------
        # Hidden width H on MXU sublanes, batch*time on the lane/N side; the two dots are
        # back-to-back so they share the (tiny) stationary operand.  f32 accumulation.
        x_obs = obs_ref[...].reshape(BB * T, D)
        x_nxt = nobs_ref[...].reshape(BB * T, D)
        h_obs = lax.dot_general(w1t, x_obs, nt_dims, preferred_element_type=f32)  # [H, BB*T]
        h_nxt = lax.dot_general(w1t, x_nxt, nt_dims, preferred_element_type=f32)  # [H, BB*T]

        def head(h):                           # [H, BB*T] -> [1, BB*T]
            h = jnp.maximum(h + b1, 0.0)
            return jnp.sum(h * w2, axis=0, keepdims=True) + b2

        value = head(h_obs)                    # state value, (batch, time) flat on lanes
        next_value = head(h_nxt)               # next state value
        val_ref[...] = value.astype(val_ref.dtype)

        # ---- TD(lambda) returns ---------------------------------------------------------
        # g_t = w_t + d_t * g_{t+1} with  w_t = r_t + gamma*(1-lmbda)*nd_t*nv_t,
        # d_t = gamma*lmbda*nd_t and the bootstrap g_T = nv_{T-1} folded into w_{T-1}.
        tpos = tpos_ref[...]                   # [1, BB*T] int32: time index within trajectory
        nd = nd_ref[...]
        is_last = tpos == (T - 1)
        d = c2 * nd
        w = rew_ref[...] + nd * next_value * (c1 + jnp.where(is_last, c2, 0.0))

        # Segmented Hillis-Steele scan of the linear recurrence along the lane axis:
        # fully vectorized, log2(T) passes, masked so it never reads across trajectories.
        acc_w, acc_d = w, d
        span = 1
        while span < T:
            valid = tpos < (T - span)
            acc_w = acc_w + acc_d * jnp.where(valid, _shift_left(acc_w, span), 0.0)
            if 2 * span < T:
                acc_d = acc_d * jnp.where(valid, _shift_left(acc_d, span), 0.0)
            span *= 2

        adv_ref[...] = (acc_w - value).astype(adv_ref.dtype)

    return kernel


# ---------------------------------------------------------------------------
# module wrapper (the "forward" glue)
# ---------------------------------------------------------------------------
class TDLambdaEstimateJAX:
    """Forward pass of torchrl's TDLambdaEstimate with a built-in deterministic
    2-layer MLP value network (obs_dim -> hidden -> 1, ReLU), fused into a single
    Pallas TPU kernel (value MLP on obs and next_obs + TD(lambda) scan)."""

    def __init__(self, gamma, lmbda, obs_dim, hidden=32, average_rewards=False,
                 input_dtype=jnp.bfloat16):
        self.gamma = float(gamma)
        self.lmbda = float(lmbda)
        self.average_rewards = average_rewards
        # bf16 inputs halve the dominant HBM bytes (obs/next_obs); accumulation stays f32.
        # In a training pipeline the cast should be fused upstream (bf16 replay buffer).
        # TODO(synk): v7x also takes fp8 on the MXU for another ~2x on input bytes; needs an
        #             accuracy check, so it is not enabled here.
        self.input_dtype = input_dtype
        k1, k2 = jax.random.split(jax.random.PRNGKey(42))
        s1 = 1.0 / jnp.sqrt(obs_dim)
        s2 = 1.0 / jnp.sqrt(hidden)
        self.w1 = jax.random.uniform(k1, (obs_dim, hidden), jnp.float32, -s1, s1)
        self.b1 = jnp.zeros((hidden,), jnp.float32)
        self.w2 = jax.random.uniform(k2, (hidden, 1), jnp.float32, -s2, s2)
        self.b2 = 0.0

    def __call__(self, obs, next_obs, reward, done):
        B, T, D = obs.shape
        H = self.w1.shape[1]

        if self.average_rewards:
            r = reward - reward.mean()
            reward = r / jnp.maximum(r.std(ddof=1), 1e-4)

        cd = self.input_dtype or jnp.float32
        in_itemsize = jnp.dtype(cd).itemsize
        BB, vmem_limit = _pick_batch_block(B, T, D, H, in_itemsize)
        grid = (B // BB,)

        obs_in = obs.astype(cd)
        nobs_in = next_obs.astype(cd)
        w1t = self.w1.T.astype(cd)                       # [H, D]
        b1_col = self.b1.reshape(H, 1)
        w2_col = self.w2.reshape(H, 1)

        # flat "(batch, time) on lanes" layout: pure reshapes, no XLA transposes anywhere
        rew_flat = reward.astype(jnp.float32).reshape(1, B * T)
        nd_flat = (1.0 - done.astype(jnp.float32)).reshape(1, B * T)
        tpos = jnp.tile(jnp.arange(T, dtype=jnp.int32), BB).reshape(1, BB * T)

        kernel = _make_td_lambda_kernel(self.gamma * (1.0 - self.lmbda),
                                        self.gamma * self.lmbda, self.b2)

        flops = 4 * B * T * D * H + 8 * B * T * H
        bytes_accessed = (2 * B * T * D * in_itemsize + 4 * B * T * 4
                          + (D * H + 2 * H) * 4 + BB * T * 4)

        adv_flat, val_flat = pl.pallas_call(
            kernel,
            out_shape=(jax.ShapeDtypeStruct((1, B * T), jnp.float32),
                       jax.ShapeDtypeStruct((1, B * T), jnp.float32)),
            grid=grid,
            in_specs=[
                pl.BlockSpec((BB, T, D), lambda b: (b, 0, 0)),      # obs
                pl.BlockSpec((BB, T, D), lambda b: (b, 0, 0)),      # next_obs
                pl.BlockSpec((1, BB * T), lambda b: (0, b)),        # reward  (flat)
                pl.BlockSpec((1, BB * T), lambda b: (0, b)),        # not_done (flat)
                pl.BlockSpec((1, BB * T), lambda b: (0, 0)),        # time index (resident)
                pl.BlockSpec((H, D), lambda b: (0, 0)),             # w1^T (resident)
                pl.BlockSpec((H, 1), lambda b: (0, 0)),             # b1
                pl.BlockSpec((H, 1), lambda b: (0, 0)),             # w2
            ],
            out_specs=(pl.BlockSpec((1, BB * T), lambda b: (0, b)),   # advantage  (flat)
                       pl.BlockSpec((1, BB * T), lambda b: (0, b))),  # state value (flat)
            compiler_params=pltpu.CompilerParams(
                dimension_semantics=("parallel",),
                vmem_limit_bytes=vmem_limit),
            cost_estimate=pl.CostEstimate(flops=flops, transcendentals=0,
                                          bytes_accessed=bytes_accessed),
        )(obs_in, nobs_in, rew_flat, nd_flat, tpos, w1t, b1_col, w2_col)

        value = val_flat.reshape(B, T, 1)
        advantage = adv_flat.reshape(B, T, 1)

        # TODO(synk): gradient_mode / detach and in-place tensordict.set have no Pallas
        #             equivalent; a dict with the computed keys is returned instead.
        return {
            "state_value": value,
            "advantage": advantage,
            "value_error": advantage,
            "reward": reward,
        }


# ---------------------------------------------------------------------------
# pure-JAX reference (same not_done-gated torchrl semantics, same input dtype)
# ---------------------------------------------------------------------------
def _ref_forward(mod, obs, next_obs, reward, done):
    B, T, D = obs.shape
    if mod.average_rewards:
        r = reward - reward.mean()
        reward = r / jnp.maximum(r.std(ddof=1), 1e-4)

    cd = mod.input_dtype or jnp.float32
    w1 = mod.w1.astype(cd)

    def mlp(x):
        h = jnp.dot(x.astype(cd), w1, preferred_element_type=jnp.float32)
        h = jnp.maximum(h + mod.b1, 0.0)
        return (jnp.dot(h, mod.w2) + mod.b2)[..., 0]

    value = mlp(obs.reshape(B * T, D)).reshape(B, T)
    next_value = mlp(next_obs.reshape(B * T, D)).reshape(B, T)
    r = reward.reshape(B, T).astype(jnp.float32)
    nd = 1.0 - done.reshape(B, T).astype(jnp.float32)

    g = next_value[:, -1] * nd[:, -1]
    rets = [None] * T
    for t in reversed(range(T)):
        g = r[:, t] + mod.gamma * nd[:, t] * (
            (1.0 - mod.lmbda) * next_value[:, t] + mod.lmbda * g)
        rets[t] = g
    returns = jnp.stack(rets, axis=1)
    adv = returns - value
    return adv.reshape(B, T, 1), value.reshape(B, T, 1)


if __name__ == "__main__":
    D, H = 32, 32
    mod = TDLambdaEstimateJAX(gamma=0.99, lmbda=0.95, obs_dim=D, hidden=H)

    base = jax.random.PRNGKey(0)
    # tiny full-batch block, a 128-aligned multi-block grid, and a long non-power-of-two T
    for i, (B, T) in enumerate([(2, 8), (256, 16), (128, 80)]):
        k = jax.random.fold_in(base, i)
        ko, kn, kr, kd = jax.random.split(k, 4)
        obs = jax.random.normal(ko, (B, T, D), jnp.float32)
        next_obs = jax.random.normal(kn, (B, T, D), jnp.float32)
        reward = jax.random.normal(kr, (B, T, 1), jnp.float32)
        done = jax.random.bernoulli(kd, 0.05, (B, T, 1))
        done = done.at[:, -1, :].set(True)           # terminal step
        done = done.at[0, T // 2, :].set(True)       # guaranteed mid-trajectory termination

        out = mod(obs, next_obs, reward, done)
        jax.block_until_ready(out["advantage"])

        ref_adv, ref_val = _ref_forward(mod, obs, next_obs, reward, done)
        assert jnp.allclose(out["advantage"], ref_adv, atol=2e-3, rtol=2e-3), \
            f"advantage mismatch at B={B} T={T}"
        assert jnp.allclose(out["state_value"], ref_val, atol=2e-3, rtol=2e-3), \
            f"state_value mismatch at B={B} T={T}"

    print("KERNEL_OK")
</pallas_src>

<mosaic_0001>
module attributes {stable_mosaic.version = 11 : i64} {
  func.func @kernel(%arg0: i32, %arg1: memref<2x8x32xbf16, #tpu.memory_space<vmem>>, %arg2: memref<2x8x32xbf16, #tpu.memory_space<vmem>>, %arg3: memref<1x16xf32, #tpu.memory_space<vmem>>, %arg4: memref<1x16xf32, #tpu.memory_space<vmem>>, %arg5: memref<1x16xi32, #tpu.memory_space<vmem>>, %arg6: memref<32x32xbf16, #tpu.memory_space<vmem>>, %arg7: memref<32x1xf32, #tpu.memory_space<vmem>>, %arg8: memref<32x1xf32, #tpu.memory_space<vmem>>, %arg9: memref<1x16xf32, #tpu.memory_space<vmem>>, %arg10: memref<1x16xf32, #tpu.memory_space<vmem>>) attributes {dimension_semantics = [#tpu.dimension_semantics<parallel>], iteration_bounds = array<i64: 1>, scalar_prefetch = 0 : i64, scratch_operands = 0 : i64, tpu.core_type = #tpu.core_type<tc>, window_params = [{transform_indices = @transform_0, window_bounds = array<i64: 2, 8, 32>}, {transform_indices = @transform_1, window_bounds = array<i64: 2, 8, 32>}, {transform_indices = @transform_2, window_bounds = array<i64: 1, 16>}, {transform_indices = @transform_3, window_bounds = array<i64: 1, 16>}, {pipeline_mode = #tpu.pipeline_mode<synchronous>, transform_indices = @transform_4, window_bounds = array<i64: 1, 16>}, {pipeline_mode = #tpu.pipeline_mode<synchronous>, transform_indices = @transform_5, window_bounds = array<i64: 32, 32>}, {pipeline_mode = #tpu.pipeline_mode<synchronous>, transform_indices = @transform_6, window_bounds = array<i64: 32, 1>}, {pipeline_mode = #tpu.pipeline_mode<synchronous>, transform_indices = @transform_7, window_bounds = array<i64: 32, 1>}, {transform_indices = @transform_8, window_bounds = array<i64: 1, 16>}, {transform_indices = @transform_9, window_bounds = array<i64: 1, 16>}]} {
    %c0 = arith.constant 0 : index
    %c0_0 = arith.constant 0 : index
    %0 = vector.load %arg6[%c0, %c0_0] : memref<32x32xbf16, #tpu.memory_space<vmem>>, vector<32x32xbf16>
    %c0_1 = arith.constant 0 : index
    %c0_2 = arith.constant 0 : index
    %1 = vector.load %arg7[%c0_1, %c0_2] : memref<32x1xf32, #tpu.memory_space<vmem>>, vector<32x1xf32>
    %c0_3 = arith.constant 0 : index
    %c0_4 = arith.constant 0 : index
    %2 = vector.load %arg8[%c0_3, %c0_4] : memref<32x1xf32, #tpu.memory_space<vmem>>, vector<32x1xf32>
    %c0_5 = arith.constant 0 : index
    %c0_6 = arith.constant 0 : index
    %c0_7 = arith.constant 0 : index
    %3 = vector.load %arg1[%c0_5, %c0_6, %c0_7] : memref<2x8x32xbf16, #tpu.memory_space<vmem>>, vector<2x8x32xbf16>
    %4 = vector.shape_cast %3 : vector<2x8x32xbf16> to vector<16x32xbf16>
    %c0_8 = arith.constant 0 : index
    %c0_9 = arith.constant 0 : index
    %c0_10 = arith.constant 0 : index
    %5 = vector.load %arg2[%c0_8, %c0_9, %c0_10] : memref<2x8x32xbf16, #tpu.memory_space<vmem>>, vector<2x8x32xbf16>
    %6 = vector.shape_cast %5 : vector<2x8x32xbf16> to vector<16x32xbf16>
    %cst = arith.constant dense<0.000000e+00> : vector<32x16xf32>
    %7 = tpu.matmul %0, %4, %cst {dimension_numbers = #tpu.dot_dimension_numbers<[1], [1], [0], [0], [0, 0, 1, 0], [], []>} : vector<32x32xbf16>, vector<16x32xbf16>, vector<32x16xf32> -> vector<32x16xf32>
    %cst_11 = arith.constant dense<0.000000e+00> : vector<32x16xf32>
    %8 = tpu.matmul %0, %6, %cst_11 {dimension_numbers = #tpu.dot_dimension_numbers<[1], [1], [0], [0], [0, 0, 1, 0], [], []>} : vector<32x32xbf16>, vector<16x32xbf16>, vector<32x16xf32> -> vector<32x16xf32>
    %9 = vector.broadcast %1 : vector<32x1xf32> to vector<32x16xf32>
    %10 = arith.addf %7, %9 : vector<32x16xf32>
    %cst_12 = arith.constant 0.000000e+00 : f32
    %11 = vector.broadcast %cst_12 : f32 to vector<32x16xf32>
    %12 = arith.maximumf %10, %11 : vector<32x16xf32>
    %13 = vector.broadcast %2 : vector<32x1xf32> to vector<32x16xf32>
    %14 = arith.mulf %12, %13 : vector<32x16xf32>
    %cst_13 = arith.constant dense<0.000000e+00> : vector<16xf32>
    %15 = vector.multi_reduction <add>, %14, %cst_13 [0] : vector<32x16xf32> to vector<16xf32>
    %16 = vector.shape_cast %15 : vector<16xf32> to vector<1x16xf32>
    %cst_14 = arith.constant 0.000000e+00 : f32
    %17 = vector.broadcast %cst_14 : f32 to vector<1x16xf32>
    %18 = arith.addf %16, %17 : vector<1x16xf32>
    %19 = vector.broadcast %1 : vector<32x1xf32> to vector<32x16xf32>
    %20 = arith.addf %8, %19 : vector<32x16xf32>
    %cst_15 = arith.constant 0.000000e+00 : f32
    %21 = vector.broadcast %cst_15 : f32 to vector<32x16xf32>
    %22 = arith.maximumf %20, %21 : vector<32x16xf32>
    %23 = vector.broadcast %2 : vector<32x1xf32> to vector<32x16xf32>
    %24 = arith.mulf %22, %23 : vector<32x16xf32>
    %cst_16 = arith.constant dense<0.000000e+00> : vector<16xf32>
    %25 = vector.multi_reduction <add>, %24, %cst_16 [0] : vector<32x16xf32> to vector<16xf32>
    %26 = vector.shape_cast %25 : vector<16xf32> to vector<1x16xf32>
    %cst_17 = arith.constant 0.000000e+00 : f32
    %27 = vector.broadcast %cst_17 : f32 to vector<1x16xf32>
    %28 = arith.addf %26, %27 : vector<1x16xf32>
    %c0_18 = arith.constant 0 : index
    %c0_19 = arith.constant 0 : index
    %29 = vector.load %arg10[%c0_18, %c0_19] : memref<1x16xf32, #tpu.memory_space<vmem>>, vector<1x16xf32>
    tpu.vector_store %arg10[%c0_18, %c0_19], %18 {strides = array<i32>} : memref<1x16xf32, #tpu.memory_space<vmem>>, vector<1x16xf32>,
    %c0_20 = arith.constant 0 : index
    %c0_21 = arith.constant 0 : index
    %30 = vector.load %arg5[%c0_20, %c0_21] : memref<1x16xi32, #tpu.memory_space<vmem>>, vector<1x16xi32>
    %c0_22 = arith.constant 0 : index
    %c0_23 = arith.constant 0 : index
    %31 = vector.load %arg4[%c0_22, %c0_23] : memref<1x16xf32, #tpu.memory_space<vmem>>, vector<1x16xf32>
    %c7_i32 = arith.constant 7 : i32
    %32 = vector.broadcast %c7_i32 : i32 to vector<1x16xi32>
    %33 = arith.cmpi eq, %30, %32 : vector<1x16xi32>
    %cst_24 = arith.constant 9.405000e-01 : f32
    %34 = vector.broadcast %cst_24 : f32 to vector<1x16xf32>
    %35 = arith.mulf %34, %31 : vector<1x16xf32>
    %c0_25 = arith.constant 0 : index
    %c0_26 = arith.constant 0 : index
    %36 = vector.load %arg3[%c0_25, %c0_26] : memref<1x16xf32, #tpu.memory_space<vmem>>, vector<1x16xf32>
    %37 = arith.mulf %31, %28 : vector<1x16xf32>
    %cst_27 = arith.constant 9.405000e-01 : f32
    %cst_28 = arith.constant 0.000000e+00 : f32
    %38 = vector.broadcast %cst_27 : f32 to vector<1x16xf32>
    %39 = vector.broadcast %cst_28 : f32 to vector<1x16xf32>
    %40 = arith.select %33, %38, %39 : vector<1x16xi1>, vector<1x16xf32>
    %cst_29 = arith.constant 4.950000e-02 : f32
    %41 = vector.broadcast %cst_29 : f32 to vector<1x16xf32>
    %42 = arith.addf %41, %40 : vector<1x16xf32>
    %43 = arith.mulf %37, %42 : vector<1x16xf32>
    %44 = arith.addf %36, %43 : vector<1x16xf32>
    %c7_i32_30 = arith.constant 7 : i32
    %45 = vector.broadcast %c7_i32_30 : i32 to vector<1x16xi32>
    %46 = arith.cmpi slt, %30, %45 : vector<1x16xi32>
    %47 = vector.extract_strided_slice %44 {offsets = [0, 1], sizes = [1, 15], strides = [1, 1]} : vector<1x16xf32> to vector<1x15xf32>
    %cst_31 = arith.constant 0.000000e+00 : f32
    %48 = vector.broadcast %cst_31 : f32 to vector<1x1xf32>
    %49 = tpu.concatenate %47, %48 in 1 : vector<1x15xf32>, vector<1x1xf32> -> vector<1x16xf32>
    %cst_32 = arith.constant 0.000000e+00 : f32
    %50 = vector.broadcast %cst_32 : f32 to vector<1x16xf32>
    %51 = arith.select %46, %49, %50 : vector<1x16xi1>, vector<1x16xf32>
    %52 = arith.mulf %35, %51 : vector<1x16xf32>
    %53 = arith.addf %44, %52 : vector<1x16xf32>
    %54 = vector.extract_strided_slice %35 {offsets = [0, 1], sizes = [1, 15], strides = [1, 1]} : vector<1x16xf32> to vector<1x15xf32>
    %cst_33 = arith.constant 0.000000e+00 : f32
    %55 = vector.broadcast %cst_33 : f32 to vector<1x1xf32>
    %56 = tpu.concatenate %54, %55 in 1 : vector<1x15xf32>, vector<1x1xf32> -> vector<1x16xf32>
    %cst_34 = arith.constant 0.000000e+00 : f32
    %57 = vector.broadcast %cst_34 : f32 to vector<1x16xf32>
    %58 = arith.select %46, %56, %57 : vector<1x16xi1>, vector<1x16xf32>
    %59 = arith.mulf %35, %58 : vector<1x16xf32>
    %c6_i32 = arith.constant 6 : i32
    %60 = vector.broadcast %c6_i32 : i32 to vector<1x16xi32>
    %61 = arith.cmpi slt, %30, %60 : vector<1x16xi32>
    %62 = vector.extract_strided_slice %53 {offsets = [0, 2], sizes = [1, 14], strides = [1, 1]} : vector<1x16xf32> to vector<1x14xf32>
    %cst_35 = arith.constant 0.000000e+00 : f32
    %63 = vector.broadcast %cst_35 : f32 to vector<1x2xf32>
    %64 = tpu.concatenate %62, %63 in 1 : vector<1x14xf32>, vector<1x2xf32> -> vector<1x16xf32>
    %cst_36 = arith.constant 0.000000e+00 : f32
    %65 = vector.broadcast %cst_36 : f32 to vector<1x16xf32>
    %66 = arith.select %61, %64, %65 : vector<1x16xi1>, vector<1x16xf32>
    %67 = arith.mulf %59, %66 : vector<1x16xf32>
    %68 = arith.addf %53, %67 : vector<1x16xf32>
    %69 = vector.extract_strided_slice %59 {offsets = [0, 2], sizes = [1, 14], strides = [1, 1]} : vector<1x16xf32> to vector<1x14xf32>
    %cst_37 = arith.constant 0.000000e+00 : f32
    %70 = vector.broadcast %cst_37 : f32 to vector<1x2xf32>
    %71 = tpu.concatenate %69, %70 in 1 : vector<1x14xf32>, vector<1x2xf32> -> vector<1x16xf32>
    %cst_38 = arith.constant 0.000000e+00 : f32
    %72 = vector.broadcast %cst_38 : f32 to vector<1x16xf32>
    %73 = arith.select %61, %71, %72 : vector<1x16xi1>, vector<1x16xf32>
    %74 = arith.mulf %59, %73 : vector<1x16xf32>
    %c4_i32 = arith.constant 4 : i32
    %75 = vector.broadcast %c4_i32 : i32 to vector<1x16xi32>
    %76 = arith.cmpi slt, %30, %75 : vector<1x16xi32>
    %77 = vector.extract_strided_slice %68 {offsets = [0, 4], sizes = [1, 12], strides = [1, 1]} : vector<1x16xf32> to vector<1x12xf32>
    %cst_39 = arith.constant 0.000000e+00 : f32
    %78 = vector.broadcast %cst_39 : f32 to vector<1x4xf32>
    %79 = tpu.concatenate %77, %78 in 1 : vector<1x12xf32>, vector<1x4xf32> -> vector<1x16xf32>
    %cst_40 = arith.constant 0.000000e+00 : f32
    %80 = vector.broadcast %cst_40 : f32 to vector<1x16xf32>
    %81 = arith.select %76, %79, %80 : vector<1x16xi1>, vector<1x16xf32>
    %82 = arith.mulf %74, %81 : vector<1x16xf32>
    %83 = arith.addf %68, %82 : vector<1x16xf32>
    %84 = arith.subf %83, %18 : vector<1x16xf32>
    %c0_41 = arith.constant 0 : index
    %c0_42 = arith.constant 0 : index
    %85 = vector.load %arg9[%c0_41, %c0_42] : memref<1x16xf32, #tpu.memory_space<vmem>>, vector<1x16xf32>
    tpu.vector_store %arg9[%c0_41, %c0_42], %84 {strides = array<i32>} : memref<1x16xf32, #tpu.memory_space<vmem>>, vector<1x16xf32>,
    return
  }
  func.func @transform_0(%arg0: i32) -> (i32, i32, i32) {
    %c0_i32 = arith.constant 0 : i32
    %c0_i32_0 = arith.constant 0 : i32
    %c0_i32_1 = arith.constant 0 : i32
    return %arg0, %c0_i32, %c0_i32_0 : i32, i32, i32
  }
  func.func @transform_1(%arg0: i32) -> (i32, i32, i32) {
    %c0_i32 = arith.constant 0 : i32
    %c0_i32_0 = arith.constant 0 : i32
    %c0_i32_1 = arith.constant 0 : i32
    return %arg0, %c0_i32, %c0_i32_0 : i32, i32, i32
  }
  func.func @transform_2(%arg0: i32) -> (i32, i32) {
    %c0_i32 = arith.constant 0 : i32
    %c0_i32_0 = arith.constant 0 : i32
    return %c0_i32, %arg0 : i32, i32
  }
  func.func @transform_3(%arg0: i32) -> (i32, i32) {
    %c0_i32 = arith.constant 0 : i32
    %c0_i32_0 = arith.constant 0 : i32
    return %c0_i32, %arg0 : i32, i32
  }
  func.func @transform_4(%arg0: i32) -> (i32, i32) {
    %c0_i32 = arith.constant 0 : i32
    %c0_i32_0 = arith.constant 0 : i32
    %c0_i32_1 = arith.constant 0 : i32
    return %c0_i32, %c0_i32_0 : i32, i32
  }
  func.func @transform_5(%arg0: i32) -> (i32, i32) {
    %c0_i32 = arith.constant 0 : i32
    %c0_i32_0 = arith.constant 0 : i32
    %c0_i32_1 = arith.constant 0 : i32
    return %c0_i32, %c0_i32_0 : i32, i32
  }
  func.func @transform_6(%arg0: i32) -> (i32, i32) {
    %c0_i32 = arith.constant 0 : i32
    %c0_i32_0 = arith.constant 0 : i32
    %c0_i32_1 = arith.constant 0 : i32
    return %c0_i32, %c0_i32_0 : i32, i32
  }
  func.func @transform_7(%arg0: i32) -> (i32, i32) {
    %c0_i32 = arith.constant 0 : i32
    %c0_i32_0 = arith.constant 0 : i32
    %c0_i32_1 = arith.constant 0 : i32
    return %c0_i32, %c0_i32_0 : i32, i32
  }
  func.func @transform_8(%arg0: i32) -> (i32, i32) {
    %c0_i32 = arith.constant 0 : i32
    %c0_i32_0 = arith.constant 0 : i32
    return %c0_i32, %arg0 : i32, i32
  }
  func.func @transform_9(%arg0: i32) -> (i32, i32) {
    %c0_i32 = arith.constant 0 : i32
    %c0_i32_0 = arith.constant 0 : i32
    return %c0_i32, %arg0 : i32, i32
  }
}

</mosaic_0001>

<bundles_post_ra>
// kernel: tpu_custom_call.1
= control target key start
LH: loop header
LB: loop body
LE: loop exit
PB: predicated region body
PF: predicated region fallthrough
CT: control target
= control target key end

     0   :  { %15 = vsyncpa [#allocation3], 0  ;;  %vm85_vm0 = vcmask 261120   ;;  %v457_v4 = vmov 0   ;;  %s619_s0 = inlined_call_operand.vmem [shape: bf16[2,8,32], index: 0, kind: input, shape index: {}]   ;;  %s620_s1 = inlined_call_operand.vmem [shape: bf16[2,8,32], index: 1, kind: input, shape index: {}]   ;;  %s621_s2 = inlined_call_operand.vmem [shape: f32[1,16], index: 2, kind: input, shape index: {}]   ;;  %s622_s3 = inlined_call_operand.vmem [shape: f32[1,16], index: 3, kind: input, shape index: {}]   ;;  %s623_s4 = inlined_call_operand.vmem [shape: s32[1,16], index: 4, kind: input, shape index: {}]   ;;  %s624_s5 = inlined_call_operand.vmem [shape: bf16[32,32], index: 5, kind: input, shape index: {}]   ;;  %s625_s6 = inlined_call_operand.vmem [shape: f32[32,1], index: 6, kind: input, shape index: {}]   ;;  %s626_s7 = inlined_call_operand.vmem [shape: f32[32,1], index: 7, kind: input, shape index: {}]   ;;  %s627_s8 = inlined_call_operand.hbm [shape: f32[1,16], index: 8, kind: output, shape index: {0}]   ;;  %s628_s9 = inlined_call_operand.hbm [shape: f32[1,16], index: 9, kind: output, shape index: {1}]  }
   0x1   :  { %v409_v0 = vld [vmem:[%s619_s0] sm:$0xff]   ;;  %407 = vset.pattern.permute.xlu0 %v457_v4  ;;  %v40_v7 = vld [vmem:[%s625_s6 + $0x10] sm:$0xff]  ;;  %v412_v8 = vld [vmem:[%s624_s5 + $0x8] sm:$0xff]   ;;  %408 = vset.pattern.permute.xlu1 %v457_v4 }
   0x2   :  { %v410_v1 = vld [vmem:[%s620_s1] sm:$0xff]   ;;  %398 = vmatprep.subr.msk.bf16.mxu0 %vm85_vm0, %v409_v0  ;;  %v93_v2 = vsel %vm85_vm0, %v409_v0, 0  ;;  %v39_v9 = vld [vmem:[%s625_s6 + $0x8] sm:$0xff] }
   0x3   :  { %v411_v3 = vld [vmem:[%s624_s5] sm:$0xff]   ;;  %399 = vmatprep.subr.msk.bf16.mxu1 %vm85_vm0, %v410_v1  ;;  %387 = vmatpush3.bf16.xpose.msra.mxu0 %v93_v2  ;;  %v193_v5 = vsel %vm85_vm0, %v410_v1, 0 }
   0x4   :  { %393 = vmatpush3.bf16.xpose.msra.mxu1 %v193_v5  ;;  %388 = vmatprep.mubr.msk.bf16.mxu0 %vm85_vm0, %v411_v3  ;;  %v38_v6 = vld [vmem:[%s625_s6] sm:$0xff] }
   0x5   :  { %394 = vmatprep.mubr.msk.bf16.mxu1 %vm85_vm0, %v411_v3  ;;  %52 = vperm.xlu0 %407, %v38_v6  }
   0x6   :  { %16 = vsyncpa [#allocation5], 0  ;;  %62 = vperm.xlu1 %408, %v40_v7   ;;  %v41_v10 = vld [vmem:[%s625_s6 + $0x18] sm:$0xff]  ;;  %v42_v11 = vld [vmem:[%s626_s7] sm:$0xff]  ;;  %v280_v15 = vlaneseq  ;;  %s458_s10 = smov 127   ;;  %vm172_vm1 = vcmask 130048  }
   0x7   :  { %v43_v12 = vld [vmem:[%s626_s7 + $0x8] sm:$0xff]  ;;  %v44_v13 = vld [vmem:[%s626_s7 + $0x10] sm:$0xff]  ;;  %v45_v14 = vld [vmem:[%s626_s7 + $0x18] sm:$0xff]  ;;  %vm287_vm3 = vcmask 121856   ;;  %vm266_vm4 = vcmask 122880   ;;  %s460_s12 = smov 126  }
   0x8   :  { %v281_v16 = vshrl.u32 %v280_v15, 7  ;;  %v561_v17 = vld [vmem:[%s622_s3] sm:$0x1]  ;;  %vm312_vm6 = vcmask 113664  }
   0x9   :  { %57 = vperm.xlu0 %407, %v39_v9   ;;  %v566_v19 = vmul.f32 0.9405, %v561_v17 }
   0xa   :  { %389 = vmatmul.mubr.msk.bf16.vlgmr.msra.gmra.mxu0 %vm85_vm0, %v412_v8  ;;  %67 = vperm.xlu1 %408, %v41_v10   ;;  %v563_v18 = vsub.s32 0, %v281_v16 }
   0xb   :  { %395 = vmatmul.mubr.msk.bf16.vlgmr.msra.gmra.mxu1 %vm85_vm0, %v412_v8 }
   0xc   :  { %v296_v20 = vrot.slane %v566_v19, %v563_v18 }
   0xd   :  { %150 = vperm.xlu0 %407, %v42_v11  }
   0xe   :  { %155 = vperm.xlu1 %408, %v43_v12  }
  0x11   :  { %160 = vperm.xlu0 %407, %v44_v13   ;;  %v582_v13 = vld [vmem:[%s623_s4] sm:$0x1] }
  0x12   :  { %165 = vperm.xlu1 %408, %v45_v14   ;;  %vm270_vm2 = vcmp.eq.s32.totalorder %v582_v13, 7  ;;  %vm278_vm5 = vcmp.lt.s32.totalorder %v582_v13, 7  ;;  %vm303_vm7 = vcmp.lt.s32.totalorder %v582_v13, 6 }
  0x16   :  { %297 = vrot.lane.b32.xlu1 %v296_v20, %s458_s10 }
  0x80   :  { %v53_v21 = vpop.permute.xlu0 %52 }
  0x81   :  { %v63_v22 = vpop.permute.xlu1 %62 }
  0x84   :  { %v58_v23 = vpop.permute.xlu0 %57 }
  0x85   :  { %v68_v24 = vpop.permute.xlu1 %67 }
  0x88   :  { %v151_v31 = vpop.permute.xlu0 %150 }
  0x89   :  { %v156_v38 = vpop.permute.xlu1 %155 }
  0x8c   :  { %v161_v50 = vpop.permute.xlu0 %160 }
  0x8d   :  { %v166_v57 = vpop.permute.xlu1 %165 }
  0xca   :  { %v390_v25 = vpop.f32.mrf.mxu0 }
  0xcb   :  { %v396_v26 = vpop.f32.mrf.mxu1  ;;  %v138_v28 = vadd.f32 %v390_v25, %v63_v22 }
  0xcc   :  { %v129_v27 = vpop.f32.mrf.mxu0  ;;  %v238_v32 = vadd.f32 %v396_v26, %v63_v22 }
  0xcd   :  { %v130_v29 = vadd.f32 %v129_v27, %v53_v21  ;;  %v229_v30 = vpop.f32.mrf.mxu1  ;;  %v146_v42 = vmax.f32 %v138_v28, 0.0  ;;  %v298_v27 = vpop.permute.xlu1 %297 }
  0xce   :  { %v230_v33 = vadd.f32 %v229_v30, %v53_v21  ;;  %v391_v34 = vpop.f32.mrf.mxu0  ;;  %v246_v45 = vmax.f32 %v238_v32, 0.0  ;;  %v300_v28 = vsel %vm287_vm3, %v298_v27, 0.0 }
  0xcf   :  { %v144_v35 = vmax.f32 %v130_v29, 0.0  ;;  %v141_v36 = vadd.f32 %v391_v34, %v68_v24  ;;  %v397_v37 = vpop.f32.mrf.mxu1  ;;  %v170_v54 = vmul.f32 %v161_v50, %v146_v42  ;;  %v301_v32 = vsel %vm278_vm5, %v300_v28, 0.0 }
  0xd0   :  { %v244_v39 = vmax.f32 %v230_v33, 0.0  ;;  %v241_v40 = vadd.f32 %v397_v37, %v68_v24  ;;  %v132_v41 = vpop.f32.mrf.mxu0  ;;  %v250_v56 = vmul.f32 %v246_v45, %v161_v50  ;;  %v302_v33 = vmul.f32 %v301_v32, %v566_v19 }
  0xd1   :  { %v133_v43 = vadd.f32 %v132_v41, %v58_v23  ;;  %v232_v44 = vpop.f32.mrf.mxu1  ;;  %v168_v47 = vmul.f32 %v151_v31, %v144_v35  ;;  %v147_v48 = vmax.f32 %v141_v36, 0.0  ;;  %v176_v2 = vsel %vm172_vm1, %v170_v54, 0.0  ;;  %v272_v35 = vld [vmem:[%s621_s2] sm:$0x1]  ;;  %s461_s2 = smov [#allocation4]  }
  0xd2   :  { %v233_v46 = vadd.f32 %v232_v44, %v58_v23  ;;  %v248_v51 = vmul.f32 %v244_v39, %v151_v31  ;;  %v247_v52 = vmax.f32 %v241_v40, 0.0  ;;  %v255_v4 = vsel %vm172_vm1, %v250_v56, 0.0  ;;  %s360_s13 = sshll.u32 %s461_s2, 4  ;;  %s361_s13 = int_to_ptr.vmem [resolvable:$true] %s360_s13 }
  0xd3   :  { %v145_v49 = vmax.f32 %v133_v43, 0.0  ;;  %v173_v59 = vsel %vm172_vm1, %v168_v47, 0.0  ;;  %v171_v60 = vmul.f32 %v166_v57, %v147_v48  ;;  %v459_v23 = vmov 0.0   ;;  %s413_s14 = scalar_lea.vmem %s361_s13, 16  ;;  %s417_s0 = scalar_lea.vmem %s361_s13, 32 }
  0xd4   :  { %v245_v53 = vmax.f32 %v233_v46, 0.0  ;;  %v252_v62 = vsel %vm172_vm1, %v248_v51, 0.0  ;;  %v251_v63 = vmul.f32 %v247_v52, %v166_v57  ;;  %v274_v24 = vsel %vm270_vm2, 0.9405, %v459_v23  ;;  %p414_p0 = scmp.ne.s32.totalorder %s361_s13, %s413_s14  ;;  %p418_p1 = scmp.lt.s32.totalorder %s361_s13, %s361_s13 }
  0xd5   :  { %v169_v55 = vmul.f32 %v156_v38, %v145_v49  ;;  %v178_v6 = vsel %vm172_vm1, %v171_v60, 0.0  ;;  %v275_v31 = vadd.f32 0.0495, %v274_v24  ;;  %v321_v36 = vrot.slane %v302_v33, %v563_v18  ;;  %p419_p2 = scmp.lt.s32.totalorder %s417_s0, %s413_s14 }
  0xd6   :  { %v249_v58 = vmul.f32 %v245_v53, %v156_v38  ;;  %v257_v8 = vsel %vm172_vm1, %v251_v63, 0.0 }
  0xd7   :  { %v174_v61 = vsel %vm172_vm1, %v169_v55, 0.0  ;;  %322 = vrot.lane.b32.xlu1 %v321_v36, %s460_s12  ;;  %p420_p3 = por %p419_p2, %p418_p1 }
  0xd8   :  { %v175_v0 = vadd.f32 %v174_v61, %v173_v59  ;;  %v253_v1 = vsel %vm172_vm1, %v249_v58, 0.0 }
  0xd9   :  { %v254_v3 = vadd.f32 %v253_v1, %v252_v62  ;;  %p421_p4 = pnand %p420_p3, %p414_p0 }
  0xda   :  { %v177_v5 = vadd.f32 %v176_v2, %v175_v0 }
  0xdb   :  { %v256_v7 = vadd.f32 %v255_v4, %v254_v3 }
  0xdc   :  { %v179_v9 = vadd.f32 %v178_v6, %v177_v5 }
  0xdd   :  { %v258_v10 = vadd.f32 %v257_v8, %v256_v7 }
  0xde   :  { %v180_v11 = vrot.slane %v179_v9, 4 }
  0xdf   :  { %v259_v12 = vrot.slane %v258_v10, 4 }
  0xe0   :  { %v181_v14 = vadd.f32 %v180_v11, %v179_v9 }
  0xe1   :  { %v260_v15 = vadd.f32 %v259_v12, %v258_v10 }
  0xe2   :  { %v182_v16 = vrot.slane %v181_v14, 2 }
  0xe3   :  { %v261_v20 = vrot.slane %v260_v15, 2 }
  0xe4   :  { %v183_v21 = vadd.f32 %v182_v16, %v181_v14 }
  0xe5   :  { %v262_v22 = vadd.f32 %v261_v20, %v260_v15 }
  0xe6   :  { %v184_v25 = vrot.slane %v183_v21, 1 }
  0xe7   :  { %v263_v26 = vrot.slane %v262_v22, 1 }
  0xe8   :  { %v185_v29 = vadd.f32 %v184_v25, %v183_v21 }
  0xe9   :  { %v264_v30 = vadd.f32 %v263_v26, %v262_v22 }
  0xea   :  { %267 = vst.msk [vmem:[#allocation4] sm:$0x1] %vm266_vm4, %v185_v29 }
  0xeb   :  { %v273_v34 = vmul.f32 %v561_v17, %v264_v30 }
  0xed   :  { %v276_v37 = vmul.f32 %v275_v31, %v273_v34 }
  0xef   :  { %v277_v38 = vadd.f32 %v276_v37, %v272_v35 }
  0xf1   :  { %v283_v39 = vrot.slane %v277_v38, %v563_v18 }
  0xf3   :  { %284 = vrot.lane.b32.xlu0 %v283_v39, %s458_s10 }
 0x165   :  { %v285_v40 = vpop.permute.xlu0 %284 }
 0x166   :  { %v288_v41 = vsel %vm287_vm3, %v285_v40, 0.0 }
 0x167   :  { %v289_v17 = vsel %vm278_vm5, %v288_v41, 0.0 }
 0x168   :  { %v290_v42 = vmul.f32 %v289_v17, %v566_v19 }
 0x16a   :  { %v291_v43 = vadd.f32 %v290_v42, %v277_v38 }
 0x16c   :  { %v308_v44 = vrot.slane %v291_v43, %v563_v18 }
 0x16e   :  { %309 = vrot.lane.b32.xlu0 %v308_v44, %s460_s12 }
 0x1e0   :  { %v310_v45 = vpop.permute.xlu0 %309 }
 0x1e1   :  { %v313_v46 = vsel %vm312_vm6, %v310_v45, 0.0 }
 0x1e2   :  { %v314_v47 = vsel %vm303_vm7, %v313_v46, 0.0 }
 0x1e3   :  { %v315_v48 = vmul.f32 %v314_v47, %v302_v33 }
 0x1e5   :  { %v316_v49 = vadd.f32 %v315_v48, %v291_v43 }
 0x1e6   :  { %424 = shalt.err (!%p421_p4)
}
 0x1e7   :  { %363 = dma.vmem_to_hbm [thread:$0]  %s361_s13, 16, %s628_s9, [#allocation5]   ;;  %v333_v19 = vrot.slane %v316_v49, %v563_v18  ;;  %v323_v50 = vpop.permute.xlu1 %322  ;;  %vm337_vm8 = vcmask 97280   ;;  %vm328_vm9 = vcmp.lt.s32.totalorder %v582_v13, 4 }
 0x1e8   :  { %s462_s16 = smov 124   ;;  %v325_v51 = vsel %vm312_vm6, %v323_v50, 0.0  ;;  %s463_s17 = smov [#allocation2]  }
 0x1e9   :  { %334 = vrot.lane.b32.xlu0 %v333_v19, %s462_s16  ;;  %v326_v52 = vsel %vm303_vm7, %v325_v51, 0.0  ;;  %s350_s9 = sshll.u32 %s463_s17, 4  ;;  %s351_s9 = int_to_ptr.vmem [resolvable:$true] %s350_s9 }
 0x1ea   :  { %v327_v54 = vmul.f32 %v326_v52, %v302_v33  ;;  %s433_s18 = scalar_lea.vmem %s351_s9, 16  ;;  %s437_s19 = scalar_lea.vmem %s351_s9, 32 }
 0x1eb   :  { %p434_p5 = scmp.ne.s32.totalorder %s351_s9, %s433_s18  ;;  %p438_p6 = scmp.lt.s32.totalorder %s351_s9, %s351_s9 }
 0x1ec   :  { %p439_p7 = scmp.lt.s32.totalorder %s437_s19, %s433_s18 }
 0x1ee   :  { %p440_p8 = por %p439_p7, %p438_p6 }
 0x1f0   :  { %p441_p9 = pnand %p440_p8, %p434_p5 }
 0x25b   :  { %v335_v53 = vpop.permute.xlu0 %334 }
 0x25c   :  { %v338_v55 = vsel %vm337_vm8, %v335_v53, 0.0 }
 0x25d   :  { %v339_v56 = vsel %vm328_vm9, %v338_v55, 0.0 }
 0x25e   :  { %v340_v57 = vmul.f32 %v339_v56, %v327_v54 }
 0x260   :  { %v341_v58 = vadd.f32 %v340_v57, %v316_v49 }
 0x262   :  { %v342_v18 = vsub.f32 %v341_v58, %v185_v29 }
 0x264   :  { %343 = vst.msk [vmem:[#allocation2] sm:$0x1] %vm266_vm4, %v342_v18 }
 0x265   :  { %444 = shalt.err (!%p441_p9)
}
 0x266   :  { %353 = dma.vmem_to_hbm [thread:$0]  %s351_s9, 16, %s627_s8, [#allocation3]  }
 0x267   :  { %453 = dma.done.wait [#allocation3], 16  }
 0x268   :  { %454 = vsyncadd [#allocation3], 4294967280 }
 0x269   :  { %455 = dma.done.wait [#allocation5], 16  }
 0x26a   :  { %456 = vsyncadd [#allocation5], 4294967280 }
 0x26b   :  { %370 = vsyncpa [#allocation3], 1 }
 0x26c   :  { %371 = vsyncpa [#allocation5], 1 }

</bundles_post_ra>
